<compile_context>
chip_gen: v5e
topology: v5e:2x2
jax: 0.10.0
libtpu: 0.0.40
codegen_flags: <defaults>
</compile_context>

<pallas_src>
import jax
import jax.numpy as jnp
from jax.experimental import pallas as pl
from jax.experimental.pallas import tpu as pltpu

OBJ_BBOXES_NUM = 5
_LANE = 128


# ----------------------------------------------------------------------------
# Parameter initialisation (matches the PyTorch module's __init__ semantics).
# ----------------------------------------------------------------------------
def _xavier_uniform(key, shape, gain):
    """shape is the torch weight shape (out_features, in_features)."""
    fan_out, fan_in = shape
    bound = gain * (6.0 / (fan_in + fan_out)) ** 0.5
    return jax.random.uniform(key, shape, jnp.float32, -bound, bound)


def _linear_bias(key, fan_in, n_out):
    bound = 1.0 / (fan_in ** 0.5)
    return jax.random.uniform(key, (n_out,), jnp.float32, -bound, bound)


# ----------------------------------------------------------------------------
# Pallas kernel: fused 3-layer MLP  relu(relu(x@W1+b1)@W2+b2)@W3+b3
# ----------------------------------------------------------------------------
def _actor_mlp_kernel(x_ref, w1_ref, b1_ref, w2_ref, b2_ref, w3_ref, b3_ref,
                      o_ref):
    # bf16 MXU inputs, f32 accumulate; bias add / ReLU kept in f32 (v5e-safe).
    x = x_ref[...].astype(jnp.bfloat16)
    h1 = jnp.dot(x, w1_ref[...], preferred_element_type=jnp.float32) + b1_ref[...]
    h1 = jnp.maximum(h1, 0.0).astype(jnp.bfloat16)
    h2 = jnp.dot(h1, w2_ref[...], preferred_element_type=jnp.float32) + b2_ref[...]
    h2 = jnp.maximum(h2, 0.0).astype(jnp.bfloat16)
    a = jnp.dot(h2, w3_ref[...], preferred_element_type=jnp.float32) + b3_ref[...]
    o_ref[...] = a.astype(o_ref.dtype)


def _pick_batch_tile(B):
    """MXU-friendly batch tile: multiple of 128, capped at 512, and >=2 grid
    steps when the batch is big enough (v7x has 2 TensorCores). Tiny batches
    use one full-array block (no padding needed)."""
    if B < 128:
        return B
    if B < 256:
        return 128
    return max(128, min(512, ((B // 2) // 128) * 128))


def actor_mlp(x, w1, b1, w2, b2, w3, b3, *, n_out):
    """x: [B, n_input] f32. Weights are [in, out] bf16 (W3 lane-padded);
    biases are [1, out] f32 (b3 lane-padded)."""
    B, n_in = x.shape
    n_feat = w1.shape[1]
    n_out_pad = w3.shape[1]          # multiple of 128 (lane-dense output)
    tb = _pick_batch_tile(B)
    grid = (pl.cdiv(B, tb),)         # ragged last block handled by Pallas masking

    out = pl.pallas_call(
        _actor_mlp_kernel,
        out_shape=jax.ShapeDtypeStruct((B, n_out_pad), jnp.float32),
        grid_spec=pl.GridSpec(
            grid=grid,
            in_specs=[
                pl.BlockSpec((tb, n_in), lambda i: (i, 0)),
                # Constant index_maps: weights/biases stay VMEM-resident
                # across the whole batch grid (no re-DMA per step).
                pl.BlockSpec((n_in, n_feat), lambda i: (0, 0)),
                pl.BlockSpec((1, n_feat), lambda i: (0, 0)),
                pl.BlockSpec((n_feat, n_feat), lambda i: (0, 0)),
                pl.BlockSpec((1, n_feat), lambda i: (0, 0)),
                pl.BlockSpec((n_feat, n_out_pad), lambda i: (0, 0)),
                pl.BlockSpec((1, n_out_pad), lambda i: (0, 0)),
            ],
            out_specs=pl.BlockSpec((tb, n_out_pad), lambda i: (i, 0)),
        ),
        compiler_params=pltpu.CompilerParams(
            dimension_semantics=("parallel",)),
    )(x, w1, b1, w2, b2, w3, b3)
    return out[:, :n_out] if n_out_pad != n_out else out


# ----------------------------------------------------------------------------
# JAX/Pallas port of ActorNetworkGraph
# ----------------------------------------------------------------------------
class ActorNetworkGraphPallas:
    def __init__(self, input_shape, output_shape, n_features, graph_model_actor,
                 *, key):
        n_input = input_shape[-1]
        n_output = output_shape[0]
        self.n_output = n_output
        self.graph_model_actor = graph_model_actor

        k1, k2, k3, k4, k5, k6 = jax.random.split(key, 6)
        gain_relu = 2.0 ** 0.5
        gain_linear = 1.0
        # torch weight shapes: (out, in); transpose to (in, out) for x @ W.
        self.w1 = _xavier_uniform(k1, (n_features, n_input), gain_relu).T.astype(jnp.bfloat16)
        self.b1 = _linear_bias(k2, n_input, n_features)[None, :]
        self.w2 = _xavier_uniform(k3, (n_features, n_features), gain_relu).T.astype(jnp.bfloat16)
        self.b2 = _linear_bias(k4, n_features, n_features)[None, :]
        # Lane-pad the final layer (static params) so the kernel's output block
        # is a multiple of 128 lanes -> unmasked stores.
        n_out_pad = ((n_output + _LANE - 1) // _LANE) * _LANE
        w3 = _xavier_uniform(k5, (n_output, n_features), gain_linear).T
        b3 = _linear_bias(k6, n_features, n_output)[None, :]
        self.w3 = jnp.pad(w3, ((0, 0), (0, n_out_pad - n_output))).astype(jnp.bfloat16)
        self.b3 = jnp.pad(b3, ((0, 0), (0, n_out_pad - n_output)))

    def __call__(self, state_goals, state_graphs, a_cont=None):
        total_len = state_goals.shape[0]
        # TODO(synk): graph_model_actor is an external, unspecified submodule;
        # it cannot be folded into the Pallas kernel without its definition.
        state_embedding = self.graph_model_actor(state_graphs)
        # Robot rows 0, 5, 10, ... -> simple strided slice (strided copy), not
        # a gather (jnp.take lowers poorly on TPU).
        batch_state_embedding = state_embedding[
            0:total_len * OBJ_BBOXES_NUM:OBJ_BBOXES_NUM]
        x = jnp.squeeze(batch_state_embedding, axis=1).astype(jnp.float32)
        if a_cont is not None:
            # TODO(synk): could be fused by splitting W1 into [emb | a_cont]
            # row blocks and passing a_cont as a second kernel input; kept as a
            # cheap JAX concat for simplicity.
            x = jnp.concatenate([x, a_cont.astype(jnp.float32)], axis=1)
        return actor_mlp(x, self.w1, self.b1, self.w2, self.b2,
                         self.w3, self.b3, n_out=self.n_output)


# ----------------------------------------------------------------------------
# Demo / self-check
# ----------------------------------------------------------------------------
if __name__ == "__main__":
    key = jax.random.PRNGKey(0)
    k_graph_w, k_graph_b, k_params, k_goals, k_nodes, k_big = jax.random.split(key, 6)

    B = 8                 # number of environments / graphs
    NODE_FEAT = 16        # raw node feature size fed to the graph model
    N_INPUT = 32          # embedding size produced by graph_model_actor
    N_FEATURES = 32       # hidden width of the actor MLP
    N_OUTPUT = 4          # action dimension

    # TODO(synk): graph_model_actor is an external, unspecified submodule; a
    # deterministic linear stand-in (NODE_FEAT -> N_INPUT, output [N, 1, D]) is
    # used here so the actor head's semantics can be exercised end to end.
    gw = jax.random.normal(k_graph_w, (NODE_FEAT, N_INPUT), jnp.float32) * 0.1
    gb = jax.random.normal(k_graph_b, (N_INPUT,), jnp.float32) * 0.01

    def graph_model_actor(node_feats):
        emb = node_feats.astype(jnp.float32) @ gw + gb      # [N_nodes, N_INPUT]
        return emb[:, None, :]                              # [N_nodes, 1, N_INPUT]

    net = ActorNetworkGraphPallas(
        input_shape=(N_INPUT,),
        output_shape=(N_OUTPUT,),
        n_features=N_FEATURES,
        graph_model_actor=graph_model_actor,
        key=k_params,
    )

    state_goals = jax.random.normal(k_goals, (B, 3), jnp.float32)
    state_graphs = jax.random.normal(k_nodes, (B * OBJ_BBOXES_NUM, NODE_FEAT),
                                     jnp.float32)

    out = jax.block_until_ready(net(state_goals, state_graphs, a_cont=None))
    assert out.shape == (B, N_OUTPUT)

    # Pure-JAX reference mirroring the kernel's bf16-input / f32-accumulate math.
    def ref_mlp(xf):
        h1 = jax.nn.relu(jnp.dot(xf.astype(jnp.bfloat16), net.w1,
                                 preferred_element_type=jnp.float32) + net.b1)
        h2 = jax.nn.relu(jnp.dot(h1.astype(jnp.bfloat16), net.w2,
                                 preferred_element_type=jnp.float32) + net.b2)
        a = jnp.dot(h2.astype(jnp.bfloat16), net.w3,
                    preferred_element_type=jnp.float32) + net.b3
        return a[:, :N_OUTPUT]

    emb = graph_model_actor(state_graphs)
    x_ref = jnp.squeeze(emb[0:B * OBJ_BBOXES_NUM:OBJ_BBOXES_NUM], axis=1)
    ref = ref_mlp(x_ref)
    assert jnp.allclose(out, ref, atol=2e-2, rtol=2e-2), "mismatch vs reference"

    # Also exercise the tiled path (tb=128, ragged last block, no wrapper pad).
    B2 = 200
    x_big = jax.random.normal(k_big, (B2, N_INPUT), jnp.float32)
    out_big = jax.block_until_ready(
        actor_mlp(x_big, net.w1, net.b1, net.w2, net.b2, net.w3, net.b3,
                  n_out=N_OUTPUT))
    assert out_big.shape == (B2, N_OUTPUT)
    assert jnp.allclose(out_big, ref_mlp(x_big), atol=2e-2, rtol=2e-2), \
        "mismatch vs reference (tiled path)"

    print("KERNEL_OK")
</pallas_src>

<mosaic_0001>
module attributes {stable_mosaic.version = 11 : i64} {
  func.func @_actor_mlp_kernel(%arg0: i32, %arg1: memref<8x32xf32, #tpu.memory_space<vmem>>, %arg2: memref<32x32xbf16, #tpu.memory_space<vmem>>, %arg3: memref<1x32xf32, #tpu.memory_space<vmem>>, %arg4: memref<32x32xbf16, #tpu.memory_space<vmem>>, %arg5: memref<1x32xf32, #tpu.memory_space<vmem>>, %arg6: memref<32x128xbf16, #tpu.memory_space<vmem>>, %arg7: memref<1x128xf32, #tpu.memory_space<vmem>>, %arg8: memref<8x128xf32, #tpu.memory_space<vmem>>) attributes {dimension_semantics = [#tpu.dimension_semantics<parallel>], iteration_bounds = array<i64: 1>, scalar_prefetch = 0 : i64, scratch_operands = 0 : i64, tpu.core_type = #tpu.core_type<tc>, window_params = [{transform_indices = @transform_0, window_bounds = array<i64: 8, 32>}, {pipeline_mode = #tpu.pipeline_mode<synchronous>, transform_indices = @transform_1, window_bounds = array<i64: 32, 32>}, {pipeline_mode = #tpu.pipeline_mode<synchronous>, transform_indices = @transform_2, window_bounds = array<i64: 1, 32>}, {pipeline_mode = #tpu.pipeline_mode<synchronous>, transform_indices = @transform_3, window_bounds = array<i64: 32, 32>}, {pipeline_mode = #tpu.pipeline_mode<synchronous>, transform_indices = @transform_4, window_bounds = array<i64: 1, 32>}, {pipeline_mode = #tpu.pipeline_mode<synchronous>, transform_indices = @transform_5, window_bounds = array<i64: 32, 128>}, {pipeline_mode = #tpu.pipeline_mode<synchronous>, transform_indices = @transform_6, window_bounds = array<i64: 1, 128>}, {transform_indices = @transform_7, window_bounds = array<i64: 8, 128>}]} {
    %c0 = arith.constant 0 : index
    %c0_0 = arith.constant 0 : index
    %0 = vector.load %arg1[%c0, %c0_0] : memref<8x32xf32, #tpu.memory_space<vmem>>, vector<8x32xf32>
    %1 = arith.truncf %0 : vector<8x32xf32> to vector<8x32xbf16>
    %c0_1 = arith.constant 0 : index
    %c0_2 = arith.constant 0 : index
    %2 = vector.load %arg2[%c0_1, %c0_2] : memref<32x32xbf16, #tpu.memory_space<vmem>>, vector<32x32xbf16>
    %cst = arith.constant dense<0.000000e+00> : vector<8x32xf32>
    %3 = tpu.matmul %1, %2, %cst {dimension_numbers = #tpu.dot_dimension_numbers<[1], [0], [0], [1], [0, 0, 1, 1], [], []>} : vector<8x32xbf16>, vector<32x32xbf16>, vector<8x32xf32> -> vector<8x32xf32>
    %c0_3 = arith.constant 0 : index
    %c0_4 = arith.constant 0 : index
    %4 = vector.load %arg3[%c0_3, %c0_4] : memref<1x32xf32, #tpu.memory_space<vmem>>, vector<1x32xf32>
    %5 = vector.broadcast %4 : vector<1x32xf32> to vector<8x32xf32>
    %6 = arith.addf %3, %5 : vector<8x32xf32>
    %cst_5 = arith.constant 0.000000e+00 : f32
    %7 = vector.broadcast %cst_5 : f32 to vector<8x32xf32>
    %8 = arith.maximumf %6, %7 : vector<8x32xf32>
    %9 = arith.truncf %8 : vector<8x32xf32> to vector<8x32xbf16>
    %c0_6 = arith.constant 0 : index
    %c0_7 = arith.constant 0 : index
    %10 = vector.load %arg4[%c0_6, %c0_7] : memref<32x32xbf16, #tpu.memory_space<vmem>>, vector<32x32xbf16>
    %cst_8 = arith.constant dense<0.000000e+00> : vector<8x32xf32>
    %11 = tpu.matmul %9, %10, %cst_8 {dimension_numbers = #tpu.dot_dimension_numbers<[1], [0], [0], [1], [0, 0, 1, 1], [], []>} : vector<8x32xbf16>, vector<32x32xbf16>, vector<8x32xf32> -> vector<8x32xf32>
    %c0_9 = arith.constant 0 : index
    %c0_10 = arith.constant 0 : index
    %12 = vector.load %arg5[%c0_9, %c0_10] : memref<1x32xf32, #tpu.memory_space<vmem>>, vector<1x32xf32>
    %13 = vector.broadcast %12 : vector<1x32xf32> to vector<8x32xf32>
    %14 = arith.addf %11, %13 : vector<8x32xf32>
    %cst_11 = arith.constant 0.000000e+00 : f32
    %15 = vector.broadcast %cst_11 : f32 to vector<8x32xf32>
    %16 = arith.maximumf %14, %15 : vector<8x32xf32>
    %17 = arith.truncf %16 : vector<8x32xf32> to vector<8x32xbf16>
    %c0_12 = arith.constant 0 : index
    %c0_13 = arith.constant 0 : index
    %18 = vector.load %arg6[%c0_12, %c0_13] : memref<32x128xbf16, #tpu.memory_space<vmem>>, vector<32x128xbf16>
    %cst_14 = arith.constant dense<0.000000e+00> : vector<8x128xf32>
    %19 = tpu.matmul %17, %18, %cst_14 {dimension_numbers = #tpu.dot_dimension_numbers<[1], [0], [0], [1], [0, 0, 1, 1], [], []>} : vector<8x32xbf16>, vector<32x128xbf16>, vector<8x128xf32> -> vector<8x128xf32>
    %c0_15 = arith.constant 0 : index
    %c0_16 = arith.constant 0 : index
    %20 = vector.load %arg7[%c0_15, %c0_16] : memref<1x128xf32, #tpu.memory_space<vmem>>, vector<1x128xf32>
    %21 = vector.broadcast %20 : vector<1x128xf32> to vector<8x128xf32>
    %22 = arith.addf %19, %21 : vector<8x128xf32>
    %c0_17 = arith.constant 0 : index
    %c0_18 = arith.constant 0 : index
    %23 = vector.load %arg8[%c0_17, %c0_18] : memref<8x128xf32, #tpu.memory_space<vmem>>, vector<8x128xf32>
    tpu.vector_store %arg8[%c0_17, %c0_18], %22 {strides = array<i32>} : memref<8x128xf32, #tpu.memory_space<vmem>>, vector<8x128xf32>,
    return
  }
  func.func @transform_0(%arg0: i32) -> (i32, i32) {
    %c0_i32 = arith.constant 0 : i32
    %c0_i32_0 = arith.constant 0 : i32
    return %arg0, %c0_i32 : i32, i32
  }
  func.func @transform_1(%arg0: i32) -> (i32, i32) {
    %c0_i32 = arith.constant 0 : i32
    %c0_i32_0 = arith.constant 0 : i32
    %c0_i32_1 = arith.constant 0 : i32
    return %c0_i32, %c0_i32_0 : i32, i32
  }
  func.func @transform_2(%arg0: i32) -> (i32, i32) {
    %c0_i32 = arith.constant 0 : i32
    %c0_i32_0 = arith.constant 0 : i32
    %c0_i32_1 = arith.constant 0 : i32
    return %c0_i32, %c0_i32_0 : i32, i32
  }
  func.func @transform_3(%arg0: i32) -> (i32, i32) {
    %c0_i32 = arith.constant 0 : i32
    %c0_i32_0 = arith.constant 0 : i32
    %c0_i32_1 = arith.constant 0 : i32
    return %c0_i32, %c0_i32_0 : i32, i32
  }
  func.func @transform_4(%arg0: i32) -> (i32, i32) {
    %c0_i32 = arith.constant 0 : i32
    %c0_i32_0 = arith.constant 0 : i32
    %c0_i32_1 = arith.constant 0 : i32
    return %c0_i32, %c0_i32_0 : i32, i32
  }
  func.func @transform_5(%arg0: i32) -> (i32, i32) {
    %c0_i32 = arith.constant 0 : i32
    %c0_i32_0 = arith.constant 0 : i32
    %c0_i32_1 = arith.constant 0 : i32
    return %c0_i32, %c0_i32_0 : i32, i32
  }
  func.func @transform_6(%arg0: i32) -> (i32, i32) {
    %c0_i32 = arith.constant 0 : i32
    %c0_i32_0 = arith.constant 0 : i32
    %c0_i32_1 = arith.constant 0 : i32
    return %c0_i32, %c0_i32_0 : i32, i32
  }
  func.func @transform_7(%arg0: i32) -> (i32, i32) {
    %c0_i32 = arith.constant 0 : i32
    %c0_i32_0 = arith.constant 0 : i32
    return %arg0, %c0_i32 : i32, i32
  }
}

</mosaic_0001>

<bundles_post_ra>
// kernel: tpu_custom_call.1
= control target key start
LH: loop header
LB: loop body
LE: loop exit
PB: predicated region body
PF: predicated region fallthrough
CT: control target
= control target key end

     0   :  { %12 = vsyncpa [#allocation3], 0  ;;  %s469_s0 = inlined_call_operand.hbm [shape: f32[8,32], index: 0, kind: input, shape index: {}]   ;;  %s470_s1 = inlined_call_operand.hbm [shape: bf16[32,32], index: 1, kind: input, shape index: {}]   ;;  %s471_s2 = inlined_call_operand.vmem [shape: f32[1,32], index: 2, kind: input, shape index: {}]   ;;  %s472_s3 = inlined_call_operand.hbm [shape: bf16[32,32], index: 3, kind: input, shape index: {}]   ;;  %s473_s4 = inlined_call_operand.vmem [shape: f32[1,32], index: 4, kind: input, shape index: {}]   ;;  %s474_s5 = inlined_call_operand.hbm [shape: bf16[32,128], index: 5, kind: input, shape index: {}]   ;;  %s475_s6 = inlined_call_operand.vmem [shape: f32[1,128], index: 6, kind: input, shape index: {}]   ;;  %s476_s7 = inlined_call_operand.hbm [shape: f32[8,128], index: 7, kind: output, shape index: {}]  }
   0x1   :  { %13 = vsyncpa [#allocation6], 0 }
   0x2   :  { %14 = vsyncpa [#allocation9], 0  ;;  %s31_s26 = sshll.u32 %s470_s1, 4  ;;  %s32_s26 = int_to_ptr.hbm [resolvable:$true] %s31_s26 }
   0x3   :  { %15 = vsyncpa [#allocation4], 0  ;;  %s395_s27 = smov [#allocation5]   ;;  %s21_s8 = sshll.u32 %s469_s0, 4  ;;  %s22_s8 = int_to_ptr.hbm [resolvable:$true] %s21_s8 }
   0x4   :  { %s33_s28 = sshll.u32 %s395_s27, 4  ;;  %s396_s9 = smov 64   ;;  %s34_s28 = int_to_ptr.vmem [resolvable:$true] %s33_s28 }
   0x5   :  { %s397_s10 = smov 4   ;;  %s398_s11 = smov [#allocation2]  }
   0x6   :  { %39 = dma.hbm_to_vmem [thread:$0]  %s32_s26, 256, %s34_s28, [#allocation6], %s396_s9, %s396_s9, %s397_s10  }
   0x7   :  { %s23_s12 = sshll.u32 %s398_s11, 4  ;;  %s46_s15 = sshll.u32 %s472_s3, 4  ;;  %s24_s12 = int_to_ptr.vmem [resolvable:$true] %s23_s12  ;;  %s47_s15 = int_to_ptr.hbm [resolvable:$true] %s46_s15 }
   0x8   :  { %26 = dma.hbm_to_vmem [thread:$0]  %s22_s8, 128, %s24_s12, [#allocation3]  }
   0x9   :  { %s61_s17 = sshll.u32 %s474_s5, 4  ;;  %s399_s18 = smov [#allocation7]   ;;  %s62_s17 = int_to_ptr.hbm [resolvable:$true] %s61_s17 }
   0xa   :  { %s48_s19 = sshll.u32 %s399_s18, 4  ;;  %s400_s0 = smov [#allocation8]   ;;  %s49_s19 = int_to_ptr.vmem [resolvable:$true] %s48_s19 }
   0xb   :  { %54 = dma.hbm_to_vmem [thread:$0]  %s47_s15, 256, %s49_s19, [#allocation6], %s396_s9, %s396_s9, %s397_s10  }
   0xc   :  { %s63_s20 = sshll.u32 %s400_s0, 4  ;;  %s64_s20 = int_to_ptr.vmem [resolvable:$true] %s63_s20 }
   0xd   :  { %69 = dma.hbm_to_vmem [thread:$0]  %s62_s17, 256, %s64_s20, [#allocation9], %s396_s9, %s396_s9, %s397_s10  }
   0xe   :  { %387 = dma.done.wait [#allocation3], 128  }
   0xf   :  { %388 = vsyncadd [#allocation3], 4294967168 }
  0x10   :  { %389 = dma.done.wait [#allocation6], 512  }
  0x11   :  { %390 = vsyncadd [#allocation6], 4294966784 }
  0x12   :  { %391 = dma.done.wait [#allocation9], 256  }
  0x13   :  { %392 = vsyncadd [#allocation9], 4294967040  ;;  %v252_v0 = vld [vmem:[#allocation5 + $0x8] sm:$0xff]  ;;  %v251_v1 = vld [vmem:[#allocation5] sm:$0xff]  ;;  %vm111_vm0 = vcmask 261120   ;;  %s401_s24 = smov [#allocation10]  }
  0x14   :  { %121 = vmatpush.bf16.msra.mxu0 %v252_v0  ;;  %v89_v2 = vld [vmem:[#allocation2] sm:$0xff]  ;;  %v253_v5 = vld [vmem:[#allocation7] sm:$0xff]  ;;  %v256_v12 = vld [vmem:[#allocation8 + $0x8] sm:$0xff]  ;;  %s210_s25 = sshll.u32 %s401_s24, 4  ;;  %s212_s28 = sshll.u32 %s476_s7, 4  ;;  %s211_s25 = int_to_ptr.vmem [resolvable:$true] %s210_s25  ;;  %s213_s28 = int_to_ptr.hbm [resolvable:$true] %s212_s28 }
  0x15   :  { %v90_v3 = vpack.c.bf16 %v89_v2, %v89_v2  ;;  %v254_v4 = vld [vmem:[#allocation7 + $0x8] sm:$0xff]  ;;  %197 = vmatpush.bf16.msra.mxu2 %v256_v12  ;;  %v255_v13 = vld [vmem:[#allocation8] sm:$0xff] }
  0x16   :  { %159 = vmatpush.bf16.msra.mxu1 %v254_v4  ;;  %v264_v6 = vld [vmem:[%s471_s2] ss:$0 sm:$0xff] }
  0x17   :  { %v265_v14 = vld [vmem:[%s473_s4] ss:$0 sm:$0xff] }
  0x18   :  { %122 = vmatpush.bf16.msra.mxu0 %v251_v1  ;;  %v266_v20 = vld [vmem:[%s475_s6] ss:$0 sm:$0xff] }
  0x19   :  { %198 = vmatpush.bf16.msra.mxu2 %v255_v13 }
  0x1a   :  { %160 = vmatpush.bf16.msra.mxu1 %v253_v5 }
  0x1b   :  { %232 = vmatmul.msk.bf16.vlgmr.msra.gmra.mxu0 %vm111_vm0, %v90_v3 }
  0x98   :  { %v124_v7 = vpop.f32.mrf.mxu0 }
  0x99   :  { %v125_v8 = vadd.f32 %v264_v6, %v124_v7 }
  0x9b   :  { %v128_v9 = vmax.f32 %v125_v8, 0.0 }
  0x9d   :  { %v129_v10 = vpack.c.bf16 %v128_v9, %v128_v9 }
  0x9f   :  { %241 = vmatmul.msk.bf16.vlgmr.msra.gmra.mxu1 %vm111_vm0, %v129_v10 }
  0xa0   :  { %v126_v11 = vpop.f32.mrf.mxu0 }
 0x11c   :  { %v162_v15 = vpop.f32.mrf.mxu1 }
 0x11d   :  { %v163_v16 = vadd.f32 %v265_v14, %v162_v15 }
 0x11f   :  { %v166_v17 = vmax.f32 %v163_v16, 0.0 }
 0x121   :  { %v167_v18 = vpack.c.bf16 %v166_v17, %v166_v17 }
 0x123   :  { %250 = vmatmul.msk.bf16.vlgmr.msra.gmra.mxu2 %vm111_vm0, %v167_v18 }
 0x124   :  { %v164_v19 = vpop.f32.mrf.mxu1 }
 0x1a6   :  { %v200_v21 = vpop.f32.mrf.mxu2 }
 0x1a7   :  { %v201_v22 = vadd.f32 %v266_v20, %v200_v21 }
 0x1a9   :  { %204 = vst [vmem:[#allocation10] sm:$0xff] %v201_v22 }
 0x1aa   :  { %215 = dma.vmem_to_hbm [thread:$0]  %s211_s25, 128, %s213_s28, [#allocation4]  }
 0x1ae   :  { %v202_v23 = vpop.f32.mrf.mxu2 }
 0x1af   :  { %393 = dma.done.wait [#allocation4], 128  }
 0x1b0   :  { %394 = vsyncadd [#allocation4], 4294967168 }
 0x1b1   :  { %220 = vsyncpa [#allocation3], 1 }
 0x1b2   :  { %221 = vsyncpa [#allocation6], 1 }
 0x1b3   :  { %222 = vsyncpa [#allocation9], 1 }
 0x1b4   :  { %223 = vsyncpa [#allocation4], 1 }

</bundles_post_ra>
